<compile_context>
chip_gen: v5e
topology: v5e:2x2
jax: 0.10.0
libtpu: 0.0.40
codegen_flags: <defaults>
</compile_context>

<pallas_src>
import functools

import jax
import jax.numpy as jnp
from jax import lax
from jax.experimental import pallas as pl
from jax.experimental.pallas import tpu as pltpu


# ---------------------------------------------------------------------------
# Fused CALayer + gating + residual kernel (single pass, blocked over batch).
# ---------------------------------------------------------------------------
def _ca_fused_kernel(res_ref, x_ref, w1t_ref, b1_ref, w2t_ref, b2_ref, o_ref,
                     *, hw_true):
    # AdaptiveAvgPool2d(1): f32 accumulation over the true H*W (lane axis).
    y = jnp.sum(res_ref[...], axis=2, dtype=jnp.float32) * (1.0 / float(hw_true))
    # Squeeze/excite MLP: two small 2-D MXU matmuls (no broadcast_to of weights).
    h = jnp.dot(y, w1t_ref[...], preferred_element_type=jnp.float32) + b1_ref[...]
    h = jnp.maximum(h, 0.0)
    z = jax.nn.sigmoid(
        jnp.dot(h, w2t_ref[...], preferred_element_type=jnp.float32) + b2_ref[...])
    # Channel gating + outer residual in the I/O dtype (bf16 stays bf16).
    zc = z.astype(o_ref.dtype)[:, :, None]                     # (bt, C, 1)
    o_ref[...] = (res_ref[...] * zc + x_ref[...]).astype(o_ref.dtype)


# ---------------------------------------------------------------------------
# HW-tiled two-pass fallback kernels (large feature maps / v7x 64 MiB VMEM).
# ---------------------------------------------------------------------------
def _ca_pool_se_kernel(res_ref, w1t_ref, b1_ref, w2t_ref, b2_ref, z_ref,
                       *, hw_true, thw):
    hw_i = pl.program_id(1)

    @pl.when(hw_i == 0)
    def _init():
        z_ref[...] = jnp.zeros_like(z_ref)

    # Mask the padded tail of the last HW tile so it contributes 0 to the pool.
    col = hw_i * thw + lax.broadcasted_iota(jnp.int32, res_ref.shape, 2)
    tile = jnp.where(col < hw_true, res_ref[...].astype(jnp.float32), 0.0)
    z_ref[...] += jnp.sum(tile, axis=2, keepdims=True)          # (bt, C, 1)

    @pl.when(hw_i == pl.num_programs(1) - 1)
    def _finalize():
        acc = z_ref[...]
        y = acc[:, :, 0] * (1.0 / float(hw_true))                # (bt, C)
        h = jnp.maximum(
            jnp.dot(y, w1t_ref[...], preferred_element_type=jnp.float32)
            + b1_ref[...], 0.0)
        zz = jax.nn.sigmoid(
            jnp.dot(h, w2t_ref[...], preferred_element_type=jnp.float32)
            + b2_ref[...])
        z_ref[...] = zz[:, :, None]


def _ca_gate_kernel(res_ref, x_ref, z_ref, o_ref):
    zc = z_ref[...].astype(o_ref.dtype)                          # (bt, C, 1)
    o_ref[...] = (res_ref[...] * zc + x_ref[...]).astype(o_ref.dtype)


# ---------------------------------------------------------------------------
# Wrapper: tiling / VMEM sizing and the pallas_call plumbing.
# ---------------------------------------------------------------------------
def _vmem_cap_bytes():
    cap = 64 << 20                       # conservative default (v7x per-core VMEM)
    try:
        info = pltpu.get_tpu_info()
        cap = int(getattr(info, "vmem_capacity_bytes", cap))
    except Exception:
        pass
    return (cap * 3) // 4                # leave headroom for Mosaic scratch


def _ca_tiled(res_f, x_f, w1t, b1r, w2t, b2r, *, hw_true, cap, tile_budget_bytes):
    """Two-pass HW-tiled variant: pool/SE accumulation kernel + gating kernel."""
    B, C, HW = res_f.shape
    C_r = w1t.shape[1]
    itemsize = jnp.dtype(res_f.dtype).itemsize

    if HW <= 128:
        thw = HW
    else:
        thw = max(128, min((tile_budget_bytes // max(C * itemsize, 1)) // 128 * 128,
                           (HW // 128) * 128))
    nhw = pl.cdiv(HW, thw)
    bt = 1  # TODO(synk): batch-block > 1 for the (large B, large HW) corner.

    pool_vmem = int(min(cap, 2 * bt * C * thw * (itemsize + 4) + (4 << 20)))
    gate_vmem = int(min(cap, 6 * bt * C * thw * itemsize + (4 << 20)))

    # Pass 1: per-image channel pool + squeeze/excite -> gate z (B, C, 1) f32.
    z = pl.pallas_call(
        functools.partial(_ca_pool_se_kernel, hw_true=hw_true, thw=thw),
        out_shape=jax.ShapeDtypeStruct((B, C, 1), jnp.float32),
        grid_spec=pl.GridSpec(
            grid=(pl.cdiv(B, bt), nhw),
            in_specs=[
                pl.BlockSpec((bt, C, thw), lambda b, h: (b, 0, h)),  # res
                pl.BlockSpec((C, C_r), lambda b, h: (0, 0)),         # W1^T
                pl.BlockSpec((1, C_r), lambda b, h: (0, 0)),         # b1
                pl.BlockSpec((C_r, C), lambda b, h: (0, 0)),         # W2^T
                pl.BlockSpec((1, C), lambda b, h: (0, 0)),           # b2
            ],
            out_specs=pl.BlockSpec((bt, C, 1), lambda b, h: (b, 0, 0)),
        ),
        compiler_params=pltpu.CompilerParams(
            dimension_semantics=("parallel", "arbitrary"),
            vmem_limit_bytes=pool_vmem,
        ),
        cost_estimate=pl.CostEstimate(
            flops=int(B * C * HW + 4 * B * C * C_r),
            transcendentals=int(B * C),
            bytes_accessed=int(B * C * HW * itemsize),
        ),
    )(res_f, w1t, b1r, w2t, b2r)

    # Pass 2: channel gating + outer residual, tiled over (batch, HW).
    out = pl.pallas_call(
        _ca_gate_kernel,
        out_shape=jax.ShapeDtypeStruct((B, C, HW), res_f.dtype),
        grid_spec=pl.GridSpec(
            grid=(pl.cdiv(B, bt), nhw),
            in_specs=[
                pl.BlockSpec((bt, C, thw), lambda b, h: (b, 0, h)),  # res
                pl.BlockSpec((bt, C, thw), lambda b, h: (b, 0, h)),  # x
                pl.BlockSpec((bt, C, 1), lambda b, h: (b, 0, 0)),    # z
            ],
            out_specs=pl.BlockSpec((bt, C, thw), lambda b, h: (b, 0, h)),
        ),
        compiler_params=pltpu.CompilerParams(
            dimension_semantics=("parallel", "parallel"),
            vmem_limit_bytes=gate_vmem,
        ),
        cost_estimate=pl.CostEstimate(
            flops=int(2 * B * C * HW),
            transcendentals=0,
            bytes_accessed=int(3 * B * C * HW * itemsize),
        ),
        input_output_aliases={0: 0},        # output reuses res's HBM buffer
    )(res_f, x_f, z)
    return out


def _ca_layer_residual(res, x, w1, b1, w2, b2, *, force_tiled=False,
                       tile_budget_bytes=2 << 20):
    """out = res * sigmoid(W2 @ relu(W1 @ avgpool(res) + b1) + b2) + x."""
    B, C, H, W = x.shape
    HW = H * W
    C_r = w1.shape[0]
    itemsize = jnp.dtype(x.dtype).itemsize

    # No spatial padding / slicing: true H*W as the (full-extent) lane dim.
    res_f = res.reshape(B, C, HW)
    x_f = x.reshape(B, C, HW)
    w1t = w1.astype(jnp.float32).T                  # (C, C_r)
    b1r = b1.reshape(1, C_r).astype(jnp.float32)
    w2t = w2.astype(jnp.float32).T                  # (C_r, C)
    b2r = b2.reshape(1, C).astype(jnp.float32)

    cap = _vmem_cap_bytes()
    per_img = C * HW * itemsize                     # one array, one image

    def step_bytes(bt):
        # res/x/out double-buffered + one f32 temp slab (pool upcast) + headroom.
        return bt * (6 * per_img + 4 * C * HW) + (2 << 20)

    # ~1-2 MiB per array per step, and enough grid steps to pipeline / feed
    # both v7x TensorCores; never force a divisor of B (partial blocks ok).
    bt = max(1, min(B,
                    max(1, tile_budget_bytes // max(per_img, 1)),
                    max(1, B // 8)))
    while bt > 1 and step_bytes(bt) > cap:
        bt -= 1
    fused_fits = step_bytes(1) <= cap

    if fused_fits and not force_tiled:
        out = pl.pallas_call(
            functools.partial(_ca_fused_kernel, hw_true=HW),
            out_shape=jax.ShapeDtypeStruct((B, C, HW), x.dtype),
            grid_spec=pl.GridSpec(
                grid=(pl.cdiv(B, bt),),
                in_specs=[
                    pl.BlockSpec((bt, C, HW), lambda i: (i, 0, 0)),   # res
                    pl.BlockSpec((bt, C, HW), lambda i: (i, 0, 0)),   # x
                    pl.BlockSpec((C, C_r), lambda i: (0, 0)),         # W1^T
                    pl.BlockSpec((1, C_r), lambda i: (0, 0)),         # b1
                    pl.BlockSpec((C_r, C), lambda i: (0, 0)),         # W2^T
                    pl.BlockSpec((1, C), lambda i: (0, 0)),           # b2
                ],
                out_specs=pl.BlockSpec((bt, C, HW), lambda i: (i, 0, 0)),
            ),
            compiler_params=pltpu.CompilerParams(
                dimension_semantics=("parallel",),
                vmem_limit_bytes=int(min(cap, max(step_bytes(bt), 4 << 20))),
            ),
            cost_estimate=pl.CostEstimate(
                flops=int(3 * B * C * HW + 4 * B * C * C_r),
                transcendentals=int(B * C),
                bytes_accessed=int(3 * B * C * HW * itemsize),
            ),
            input_output_aliases={0: 0},    # output reuses res's HBM buffer
        )(res_f, x_f, w1t, b1r, w2t, b2r)
        return out.reshape(B, C, H, W)

    out = _ca_tiled(res_f, x_f, w1t, b1r, w2t, b2r, hw_true=HW, cap=cap,
                    tile_budget_bytes=tile_budget_bytes)
    return out.reshape(B, C, H, W)


# ---------------------------------------------------------------------------
# Body: Conv_ (k x k, stride 1, replicate padding) -> PReLU -> Conv_
# ---------------------------------------------------------------------------
def _conv2d_replicate(x, w, b):
    """k x k conv, stride 1, replicate ('edge') padding, f32 accumulation."""
    k = w.shape[-1]
    p = (k - 1) // 2
    xp = jnp.pad(x, ((0, 0), (0, 0), (p, p), (p, p)), mode="edge")
    y = lax.conv_general_dilated(
        xp, w.astype(x.dtype), window_strides=(1, 1), padding="VALID",
        dimension_numbers=("NCHW", "OIHW", "NCHW"),
        preferred_element_type=jnp.float32)
    if b is not None:
        y = y + b.astype(jnp.float32)[None, :, None, None]
    return y


def _cab_impl(x, body_w1, body_b1, prelu_alpha, body_w2, body_b2,
              ca_w1, ca_b1, ca_w2, ca_b2, *, force_tiled=False,
              tile_budget_bytes=2 << 20):
    """CAB: res = Conv(PReLU(Conv(x))); res = CA(res); return res + x."""
    r = _conv2d_replicate(x, body_w1, body_b1)
    alpha = jnp.asarray(prelu_alpha, dtype=r.dtype)
    if alpha.ndim > 0 and alpha.size > 1:           # per-channel PReLU
        alpha = alpha.reshape(1, -1, 1, 1)
    r = jnp.where(r >= 0, r, alpha * r)
    r = _conv2d_replicate(r.astype(x.dtype), body_w2, body_b2)
    res = r.astype(x.dtype)
    return _ca_layer_residual(res, x, ca_w1, ca_b1, ca_w2, ca_b2,
                              force_tiled=force_tiled,
                              tile_budget_bytes=tile_budget_bytes)


cab_forward = jax.jit(_cab_impl, static_argnames=("force_tiled",
                                                  "tile_budget_bytes"))


# ---------------------------------------------------------------------------
# Independent pure-JAX reference mirroring the PyTorch module.
# ---------------------------------------------------------------------------
def _conv2d_ref(x, w, b):
    Bn, _, H, W = x.shape
    k = w.shape[-1]
    p = (k - 1) // 2
    xp = jnp.pad(x, ((0, 0), (0, 0), (p, p), (p, p)), mode="edge")
    out = jnp.zeros((Bn, w.shape[0], H, W), jnp.float32)
    for dy in range(k):
        for dx in range(k):
            patch = xp[:, :, dy:dy + H, dx:dx + W]
            out = out + jnp.einsum("oi,bihw->bohw",
                                   w[:, :, dy, dx].astype(jnp.float32), patch)
    if b is not None:
        out = out + b.astype(jnp.float32)[None, :, None, None]
    return out


def cab_reference(x, body_w1, body_b1, prelu_alpha, body_w2, body_b2,
                  ca_w1, ca_b1, ca_w2, ca_b2):
    xf = x.astype(jnp.float32)
    alpha = jnp.asarray(prelu_alpha, jnp.float32)
    if alpha.ndim > 0 and alpha.size > 1:
        alpha = alpha.reshape(1, -1, 1, 1)
    r = _conv2d_ref(xf, body_w1, body_b1)
    r = jnp.where(r >= 0, r, alpha * r)
    r = _conv2d_ref(r, body_w2, body_b2)
    y = jnp.mean(r, axis=(2, 3))
    h = jnp.maximum(y @ ca_w1.astype(jnp.float32).T
                    + ca_b1.astype(jnp.float32), 0.0)
    z = jax.nn.sigmoid(h @ ca_w2.astype(jnp.float32).T
                       + ca_b2.astype(jnp.float32))
    return r * z[:, :, None, None] + xf


# ---------------------------------------------------------------------------
# Self-test
# ---------------------------------------------------------------------------
if __name__ == "__main__":
    def make_case(B, C, H, W, k_size, reduction, seed):
        C_r = C // reduction
        key = jax.random.PRNGKey(seed)
        ks = jax.random.split(key, 9)
        x = jax.random.normal(ks[0], (B, C, H, W), jnp.float32)
        args = dict(
            body_w1=jax.random.normal(ks[1], (C, C, k_size, k_size),
                                      jnp.float32) * 0.1,
            body_b1=jax.random.normal(ks[2], (C,), jnp.float32) * 0.1,
            prelu_alpha=jnp.float32(0.25),              # nn.PReLU() default init
            body_w2=jax.random.normal(ks[3], (C, C, k_size, k_size),
                                      jnp.float32) * 0.1,
            body_b2=jax.random.normal(ks[4], (C,), jnp.float32) * 0.1,
            ca_w1=jax.random.normal(ks[5], (C_r, C), jnp.float32) * 0.1,
            ca_b1=jax.random.normal(ks[6], (C_r,), jnp.float32) * 0.1,
            ca_w2=jax.random.normal(ks[7], (C, C_r), jnp.float32) * 0.1,
            ca_b2=jax.random.normal(ks[8], (C,), jnp.float32) * 0.1,
        )
        return x, args

    def run(x, args, **kw):
        return cab_forward(x, args["body_w1"], args["body_b1"],
                           args["prelu_alpha"], args["body_w2"], args["body_b2"],
                           args["ca_w1"], args["ca_b1"], args["ca_w2"],
                           args["ca_b2"], **kw)

    def check(out, x, args, name, tol=5e-4):
        ref = cab_reference(x, args["body_w1"], args["body_b1"],
                            args["prelu_alpha"], args["body_w2"], args["body_b2"],
                            args["ca_w1"], args["ca_b1"], args["ca_w2"],
                            args["ca_b2"])
        assert out.shape == x.shape, f"{name}: shape {out.shape}"
        assert out.dtype == x.dtype, f"{name}: dtype {out.dtype}"
        err = float(jnp.max(jnp.abs(out.astype(jnp.float32) - ref)))
        assert err < tol, f"{name}: max abs err = {err}"

    # Test A: fused single-pass path (H*W multiple of 128).
    xA, argsA = make_case(B=2, C=16, H=16, W=16, k_size=3, reduction=4, seed=0)
    outA = run(xA, argsA)
    jax.block_until_ready(outA)
    check(outA, xA, argsA, "fused-256")

    # Test B: fused path with H*W NOT a multiple of 128 (no pad/slice needed).
    xB, argsB = make_case(B=3, C=16, H=15, W=15, k_size=3, reduction=4, seed=1)
    outB = run(xB, argsB)
    jax.block_until_ready(outB)
    check(outB, xB, argsB, "fused-225")

    # Test C: forced HW-tiled two-pass path (exercises the pool accumulation
    # across HW tiles, the tail mask, and the partial-block gating writes).
    outC = run(xB, argsB, force_tiled=True, tile_budget_bytes=8 * 1024)
    jax.block_until_ready(outC)
    check(outC, xB, argsB, "tiled-225")

    print("KERNEL_OK")
</pallas_src>

<mosaic_0001>
module attributes {stable_mosaic.version = 11 : i64} {
  func.func @_ca_fused_kernel(%arg0: i32, %arg1: memref<1x16x256xf32, #tpu.memory_space<vmem>>, %arg2: memref<1x16x256xf32, #tpu.memory_space<vmem>>, %arg3: memref<16x4xf32, #tpu.memory_space<vmem>>, %arg4: memref<1x4xf32, #tpu.memory_space<vmem>>, %arg5: memref<4x16xf32, #tpu.memory_space<vmem>>, %arg6: memref<1x16xf32, #tpu.memory_space<vmem>>, %arg7: memref<1x16x256xf32, #tpu.memory_space<vmem>>) attributes {dimension_semantics = [#tpu.dimension_semantics<parallel>], iteration_bounds = array<i64: 2>, scalar_prefetch = 0 : i64, scratch_operands = 0 : i64, tpu.core_type = #tpu.core_type<tc>, window_params = [{transform_indices = @transform_0, window_bounds = array<i64: 1, 16, 256>}, {transform_indices = @transform_1, window_bounds = array<i64: 1, 16, 256>}, {pipeline_mode = #tpu.pipeline_mode<synchronous>, transform_indices = @transform_2, window_bounds = array<i64: 16, 4>}, {pipeline_mode = #tpu.pipeline_mode<synchronous>, transform_indices = @transform_3, window_bounds = array<i64: 1, 4>}, {pipeline_mode = #tpu.pipeline_mode<synchronous>, transform_indices = @transform_4, window_bounds = array<i64: 4, 16>}, {pipeline_mode = #tpu.pipeline_mode<synchronous>, transform_indices = @transform_5, window_bounds = array<i64: 1, 16>}, {transform_indices = @transform_6, window_bounds = array<i64: 1, 16, 256>}]} {
    %c0 = arith.constant 0 : index
    %c0_0 = arith.constant 0 : index
    %c0_1 = arith.constant 0 : index
    %0 = vector.load %arg1[%c0, %c0_0, %c0_1] : memref<1x16x256xf32, #tpu.memory_space<vmem>>, vector<1x16x256xf32>
    %cst = arith.constant dense<0.000000e+00> : vector<1x16xf32>
    %1 = vector.multi_reduction <add>, %0, %cst [2] : vector<1x16x256xf32> to vector<1x16xf32>
    %cst_2 = arith.constant 3.906250e-03 : f32
    %2 = vector.broadcast %cst_2 : f32 to vector<1x16xf32>
    %3 = arith.mulf %1, %2 : vector<1x16xf32>
    %c0_3 = arith.constant 0 : index
    %c0_4 = arith.constant 0 : index
    %4 = vector.load %arg3[%c0_3, %c0_4] : memref<16x4xf32, #tpu.memory_space<vmem>>, vector<16x4xf32>
    %cst_5 = arith.constant dense<0.000000e+00> : vector<1x4xf32>
    %5 = tpu.matmul %3, %4, %cst_5 {dimension_numbers = #tpu.dot_dimension_numbers<[1], [0], [0], [1], [0, 0, 1, 1], [], []>} : vector<1x16xf32>, vector<16x4xf32>, vector<1x4xf32> -> vector<1x4xf32>
    %c0_6 = arith.constant 0 : index
    %c0_7 = arith.constant 0 : index
    %6 = vector.load %arg4[%c0_6, %c0_7] : memref<1x4xf32, #tpu.memory_space<vmem>>, vector<1x4xf32>
    %7 = arith.addf %5, %6 : vector<1x4xf32>
    %cst_8 = arith.constant 0.000000e+00 : f32
    %8 = vector.broadcast %cst_8 : f32 to vector<1x4xf32>
    %9 = arith.maximumf %7, %8 : vector<1x4xf32>
    %c0_9 = arith.constant 0 : index
    %c0_10 = arith.constant 0 : index
    %10 = vector.load %arg5[%c0_9, %c0_10] : memref<4x16xf32, #tpu.memory_space<vmem>>, vector<4x16xf32>
    %cst_11 = arith.constant dense<0.000000e+00> : vector<1x16xf32>
    %11 = tpu.matmul %9, %10, %cst_11 {dimension_numbers = #tpu.dot_dimension_numbers<[1], [0], [0], [1], [0, 0, 1, 1], [], []>} : vector<1x4xf32>, vector<4x16xf32>, vector<1x16xf32> -> vector<1x16xf32>
    %c0_12 = arith.constant 0 : index
    %c0_13 = arith.constant 0 : index
    %12 = vector.load %arg6[%c0_12, %c0_13] : memref<1x16xf32, #tpu.memory_space<vmem>>, vector<1x16xf32>
    %13 = arith.addf %11, %12 : vector<1x16xf32>
    %14 = arith.negf %13 : vector<1x16xf32>
    %15 = math.exp %14 : vector<1x16xf32>
    %cst_14 = arith.constant 1.000000e+00 : f32
    %16 = vector.broadcast %cst_14 : f32 to vector<1x16xf32>
    %17 = arith.addf %16, %15 : vector<1x16xf32>
    %18 = arith.divf %16, %17 : vector<1x16xf32>
    %19 = vector.shape_cast %18 : vector<1x16xf32> to vector<1x16x1xf32>
    %c0_15 = arith.constant 0 : index
    %c0_16 = arith.constant 0 : index
    %c0_17 = arith.constant 0 : index
    %20 = vector.load %arg1[%c0_15, %c0_16, %c0_17] : memref<1x16x256xf32, #tpu.memory_space<vmem>>, vector<1x16x256xf32>
    %21 = vector.broadcast %19 : vector<1x16x1xf32> to vector<1x16x256xf32>
    %22 = arith.mulf %20, %21 : vector<1x16x256xf32>
    %c0_18 = arith.constant 0 : index
    %c0_19 = arith.constant 0 : index
    %c0_20 = arith.constant 0 : index
    %23 = vector.load %arg2[%c0_18, %c0_19, %c0_20] : memref<1x16x256xf32, #tpu.memory_space<vmem>>, vector<1x16x256xf32>
    %24 = arith.addf %22, %23 : vector<1x16x256xf32>
    %c0_21 = arith.constant 0 : index
    %c0_22 = arith.constant 0 : index
    %c0_23 = arith.constant 0 : index
    %25 = vector.load %arg7[%c0_21, %c0_22, %c0_23] : memref<1x16x256xf32, #tpu.memory_space<vmem>>, vector<1x16x256xf32>
    tpu.vector_store %arg7[%c0_21, %c0_22, %c0_23], %24 {strides = array<i32>} : memref<1x16x256xf32, #tpu.memory_space<vmem>>, vector<1x16x256xf32>,
    return
  }
  func.func @transform_0(%arg0: i32) -> (i32, i32, i32) {
    %c0_i32 = arith.constant 0 : i32
    %c0_i32_0 = arith.constant 0 : i32
    %c0_i32_1 = arith.constant 0 : i32
    return %arg0, %c0_i32, %c0_i32_0 : i32, i32, i32
  }
  func.func @transform_1(%arg0: i32) -> (i32, i32, i32) {
    %c0_i32 = arith.constant 0 : i32
    %c0_i32_0 = arith.constant 0 : i32
    %c0_i32_1 = arith.constant 0 : i32
    return %arg0, %c0_i32, %c0_i32_0 : i32, i32, i32
  }
  func.func @transform_2(%arg0: i32) -> (i32, i32) {
    %c0_i32 = arith.constant 0 : i32
    %c0_i32_0 = arith.constant 0 : i32
    %c0_i32_1 = arith.constant 0 : i32
    return %c0_i32, %c0_i32_0 : i32, i32
  }
  func.func @transform_3(%arg0: i32) -> (i32, i32) {
    %c0_i32 = arith.constant 0 : i32
    %c0_i32_0 = arith.constant 0 : i32
    %c0_i32_1 = arith.constant 0 : i32
    return %c0_i32, %c0_i32_0 : i32, i32
  }
  func.func @transform_4(%arg0: i32) -> (i32, i32) {
    %c0_i32 = arith.constant 0 : i32
    %c0_i32_0 = arith.constant 0 : i32
    %c0_i32_1 = arith.constant 0 : i32
    return %c0_i32, %c0_i32_0 : i32, i32
  }
  func.func @transform_5(%arg0: i32) -> (i32, i32) {
    %c0_i32 = arith.constant 0 : i32
    %c0_i32_0 = arith.constant 0 : i32
    %c0_i32_1 = arith.constant 0 : i32
    return %c0_i32, %c0_i32_0 : i32, i32
  }
  func.func @transform_6(%arg0: i32) -> (i32, i32, i32) {
    %c0_i32 = arith.constant 0 : i32
    %c0_i32_0 = arith.constant 0 : i32
    %c0_i32_1 = arith.constant 0 : i32
    return %arg0, %c0_i32, %c0_i32_0 : i32, i32, i32
  }
}

</mosaic_0001>

<bundles_post_ra>
// kernel: _cab_impl.1
= control target key start
LH: loop header
LB: loop body
LE: loop exit
PB: predicated region body
PF: predicated region fallthrough
CT: control target
= control target key end

     0   :  { %s543_s21 = smov 0   ;;  %s599_s0 = inlined_call_operand.vmem [shape: f32[2,16,256], index: 0, kind: input, shape index: {}, may-alias: {0,6}]   ;;  %s600_s1 = inlined_call_operand.vmem [shape: f32[2,16,256], index: 1, kind: input, shape index: {}]   ;;  %s601_s2 = inlined_call_operand.vmem [shape: f32[16,4], index: 2, kind: input, shape index: {}]   ;;  %s602_s3 = inlined_call_operand.vmem [shape: f32[1,4], index: 3, kind: input, shape index: {}]   ;;  %s603_s4 = inlined_call_operand.vmem [shape: f32[4,16], index: 4, kind: input, shape index: {}]   ;;  %s604_s5 = inlined_call_operand.vmem [shape: f32[1,16], index: 5, kind: input, shape index: {}]   ;;  %s605_s6 = inlined_call_operand.vmem [shape: f32[2,16,256], index: 6, kind: output, shape index: {}, may-alias: {0,6}]  }
   0x1 LB: > { %s465_s22 = sadd.s32 4294967295, %s506_s21   ;;  %p469_p0 = scmp.ge.s32.totalorder %s506_s21, 1  ;;  %s506_s21 = sphi %s543_s21, %s16_s21  }
   0x2   : > { %p222_p1 = scmp.lt.s32.totalorder %s506_s21, 3 }
   0x4   : > { %p223_p2 = pnand %p469_p0, %p222_p1 }
   0x5   : > { %p257_p3 = scmp.lt.s32.totalorder (!%p223_p2), %s465_s22, 1 }
   0x6   : > { %226 = sbr.rel (%p223_p2) target bundleno = 571 (0x23b), region = 44 }
   0xb   : > { %s607_s22 = smov (!%p257_p3, %s465_s22), 1  ;;  %v285_v6 = vld [vmem:[%s601_s2 + $0x8] sm:$0xff]  ;;  %v284_v7 = vld [vmem:[%s601_s2] sm:$0xff]  ;;  %v289_v9 = vlaneseq  ;;  %vm294_vm0 = vcmask 130112   ;;  %vm296_vm1 = vcmask 130048   ;;  %vm326_vm2 = vcmask 1043456  }
   0xc   : > { %s551_s23 = sshll.u32 %s607_s22, 5  ;;  %313 = vmatpush.msra.mxu0 %v285_v6  ;;  %v320_v18 = vld [vmem:[%s603_s4] sm:$0xf]  ;;  %vm322_vm3 = vcmask 31744  }
   0xd   : > { %s261_s26 = scalar_lea.vmem %s599_s0, %s551_s23  ;;  %v290_v10 = vand.u32 127, %v289_v9  ;;  %477 = vmatpush.msk.msra.mxu1 %vm326_vm2, %v320_v18  ;;  %v286_v19 = vld [vmem:[%s602_s3] sm:$0x1]  ;;  %v371_v23 = vshrl.u32 %v289_v9, 7  ;;  %s266_s15 = scalar_lea.vmem %s600_s1, %s551_s23 }
   0xe   : > { %v557_v0 = vld [vmem:[%s261_s26] sm:$0xff]  ;;  %v559_v1 = vld [vmem:[%s261_s26 + $0x8] sm:$0xff]  ;;  %v563_v3 = vld [vmem:[%s261_s26 + $0x10] sm:$0xff]  ;;  %314 = vmatpush.msra.mxu0 %v284_v7  ;;  %s271_s18 = scalar_lea.vmem %s605_s6, %s551_s23 }
   0xf   : > { %v276_v2 = vadd.f32 %v559_v1, %v557_v0  ;;  %v565_v4 = vld [vmem:[%s261_s26 + $0x18] sm:$0xff]  ;;  %v292_v12 = vadd.s32 4294967288, %v290_v10  ;;  %493 = vset.pattern.permute.xlu1 %v371_v23  ;;  %v378_v24 = vadd.s32 8, %v371_v23  ;;  %v321_v25 = vld [vmem:[%s604_s5] sm:$0x1]  ;;  %v387_v43 = vld [vmem:[%s266_s15 + $0x8] sm:$0xff] }
  0x10   : > { %v279_v5 = vadd.f32 %v565_v4, %v563_v3  ;;  %v386_v42 = vld [vmem:[%s266_s15] sm:$0xff]  ;;  %v388_v49 = vld [vmem:[%s266_s15 + $0x10] sm:$0xff]  ;;  %v389_v50 = vld [vmem:[%s266_s15 + $0x18] sm:$0xff] }
  0x11   : > { %277 = vadd.xlane.f32.xlu0 %v276_v2 }
  0x12   : > { %495 = vset.pattern.permute.xlu0 %v378_v24 }
  0x19   : > { %280 = vadd.xlane.f32.xlu0 %v279_v5 }
  0x84   : > { %v278_v8 = vpop.xlane.xlu0 %277 }
  0x85   : > { %v282_v11 = vmul.f32 0.00390625, %v278_v8 }
  0x87   : > { %v291_v15 = vperm.slane %v282_v11, %v290_v10 }
  0x8c   : > { %v281_v13 = vpop.xlane.xlu0 %280 }
  0x8d   : > { %v283_v14 = vmul.f32 0.00390625, %v281_v13 }
  0x8f   : > { %v293_v16 = vperm.slane %v283_v14, %v292_v12 }
  0x91   : > { %v295_v17 = vsel %vm294_vm0, %v293_v16, %v291_v15 }
  0x92   : > { %476 = vmatmul.msk.f32.vlgmr.msra.gmra.mxu0 %vm296_vm1, %v295_v17 }
 0x10f   : > { %v316_v20 = vpop.f32.mrf.mxu0 }
 0x110   : > { %v317_v21 = vadd.f32 %v316_v20, %v286_v19 }
 0x112   : > { %v319_v22 = vmax.f32 %v317_v21, 0.0 }
 0x114   : > { %478 = vmatmul.msk.f32.vlgmr.msra.gmra.mxu1 %vm322_vm3, %v319_v22 }
 0x191   : > { %v347_v26 = vpop.f32.mrf.mxu1 }
 0x192   : > { %v348_v27 = vadd.f32 %v347_v26, %v321_v25 }
 0x194   : > { %v479_v28 = vmul.f32 -1.442695, %v348_v27 }
 0x196   : > { %496 = vpow2.f32 %v479_v28 }
 0x19c   : > { %v497_v29 = vpop.eup %496 }
 0x19d   : > { %v353_v30 = vadd.f32 1.0, %v497_v29 }
 0x19f   : > { %498 = vrcp.f32 %v353_v30  ;;  %v365_v34 = vand.u32 2147483648, %v353_v30  ;;  %v363_v36 = vand.u32 2147483647, %v353_v30  ;;  %vm359_vm5 = vweird.f32 %v353_v30 }
 0x1a1   : > { %v366_v38 = vor.u32 1.1754944e-38, %v365_v34  ;;  %vm364_vm7 = vcmp.eq.f32.partialorder %v363_v36, 8.507059e+37 }
 0x1a5   : > { %v499_v31 = vpop.eup %498 }
 0x1a6   : > { %v355_v32 = vmul.f32 %v499_v31, %v353_v30  ;;  %vm360_vm4 = vweird.f32 %v499_v31 }
 0x1a7   : > { %vm361_vm6 = vmor %vm359_vm5, %vm360_vm4 }
 0x1a8   : > { %v356_v33 = vsub.f32 1.0, %v355_v32 }
 0x1aa   : > { %v357_v35 = vmul.f32 %v499_v31, %v356_v33 }
 0x1ac   : > { %v358_v37 = vadd.f32 %v499_v31, %v357_v35 }
 0x1ae   : > { %v362_v39 = vsel %vm361_vm6, %v499_v31, %v358_v37 }
 0x1af   : > { %v367_v40 = vsel %vm364_vm7, %v366_v38, %v362_v39 }
 0x1b0   : > { %v369_v41 = vperm.slane %v367_v40, 0 }
 0x1b2   : > { %374 = vperm.xlu1 %493, %v369_v41  }
 0x1ba   : > { %494 = vset.pattern.permute.xlu1 %v378_v24 }
 0x1c2   : > { %380 = vperm.xlu1 %494, %v369_v41  }
 0x224   : > { %v375_v44 = vpop.permute.xlu1 %374 }
 0x225   : > { %v382_v45 = vmul.f32 %v375_v44, %v557_v0  ;;  %v383_v46 = vmul.f32 %v375_v44, %v559_v1 }
 0x227   : > { %v390_v47 = vadd.f32 %v386_v42, %v382_v45  ;;  %v391_v48 = vadd.f32 %v387_v43, %v383_v46 }
 0x229   : > { %394 = vst [vmem:[%s271_s18] sm:$0xff] %v390_v47 }
 0x22a   : > { %395 = vst [vmem:[%s271_s18 + $0x8] sm:$0xff] %v391_v48 }
 0x234   : > { %v381_v51 = vpop.permute.xlu1 %380 }
 0x235   : > { %v384_v52 = vmul.f32 %v381_v51, %v563_v3  ;;  %v385_v53 = vmul.f32 %v381_v51, %v565_v4 }
 0x237   : > { %v392_v54 = vadd.f32 %v388_v49, %v384_v52  ;;  %v393_v55 = vadd.f32 %v389_v50, %v385_v53 }
 0x239   : > { %396 = vst [vmem:[%s271_s18 + $0x10] sm:$0xff] %v392_v54 }
 0x23a   : > { %397 = vst [vmem:[%s271_s18 + $0x18] sm:$0xff] %v393_v55 }
 0x23b PF: > { %s16_s21 = sadd.s32 1, %s506_s21  }
 0x23c   : > { %p13_p4 = scmp.ge.s32.totalorder %s16_s21, 4  }
 0x23e   :  { %15 = sbr.rel (!%p13_p4) target bundleno = 1 (0x1), region = 77 }

</bundles_post_ra>
